<compile_context>
chip_gen: v7x
topology: tpu7x:2x2x1
jax: 0.10.0
libtpu: 0.0.40
codegen_flags: <defaults>
</compile_context>

<pallas_src>
import jax
import jax.numpy as jnp
from jax.experimental import pallas as pl
from jax.experimental.pallas import tpu as pltpu

IN_DIM = 784          # 1 * 28 * 28
HID_DIM = 616


def _default_hidden_tile():
    """256-wide hidden tiles on v6e/v7x (fewer grid steps, full-width MXU);
    128 on v5e (128-wide MXU, slower HBM -> avoid extra weight padding)."""
    try:
        kind = jax.devices()[0].device_kind.lower()
        if "v5e" in kind or "v5 lite" in kind or "v5lite" in kind:
            return 128
    except Exception:
        pass
    return 256


HID_TILE = _default_hidden_tile()
HID_PAD = pl.cdiv(HID_DIM, HID_TILE) * HID_TILE   # 640 (v5e) or 768 (v6e/v7x)
N_HID_TILES = HID_PAD // HID_TILE


def _encoder_fc_kernel(x_ref, w1_ref, b1_ref, w2_ref, b2_ref, o_ref):
    k = pl.program_id(1)

    # Layer 1 for one hidden tile: (BT, 784) @ (784, HID_TILE),
    # bf16 MXU inputs with f32 accumulation; bias + ReLU in f32.
    h = jnp.dot(x_ref[...], w1_ref[...], preferred_element_type=jnp.float32)
    h = jnp.maximum(h + b1_ref[k], 0.0)          # b1_ref[k]: (1, HID_TILE)

    # Layer 2 partial product for this hidden tile, accumulated directly into the
    # VMEM-resident output block (same output block index for every k).
    partial = jnp.dot(h.astype(jnp.bfloat16), w2_ref[...],
                      preferred_element_type=jnp.float32)

    @pl.when(k == 0)
    def _():
        o_ref[...] = partial

    @pl.when(k != 0)
    def _():
        o_ref[...] = o_ref[...] + partial

    @pl.when(k == pl.num_programs(1) - 1)
    def _():
        o_ref[...] = jnp.maximum(o_ref[...] + b2_ref[...], 0.0)


def prepare_params(w1, b1, w2, b2):
    """One-time (NOT per-call) parameter prep: pad the hidden dim 616 -> HID_PAD,
    store matmul operands in bf16, and lay out w1/b1 tile-major so each hidden
    tile is a single contiguous DMA burst. Biases stay f32."""
    latent = w2.shape[1]
    w1_pad = jnp.zeros((IN_DIM, HID_PAD), jnp.float32).at[:, :HID_DIM].set(
        w1.astype(jnp.float32))
    w1p = (w1_pad.reshape(IN_DIM, N_HID_TILES, HID_TILE)
                 .transpose(1, 0, 2)                  # tile-major, contiguous tiles
                 .astype(jnp.bfloat16))
    b1_pad = jnp.zeros((HID_PAD,), jnp.float32).at[:HID_DIM].set(
        b1.astype(jnp.float32))
    b1p = b1_pad.reshape(N_HID_TILES, 1, HID_TILE)
    w2p = jnp.zeros((HID_PAD, latent), jnp.bfloat16).at[:HID_DIM, :].set(
        w2.astype(jnp.bfloat16))
    b2p = b2.reshape(1, latent).astype(jnp.float32)
    return w1p, b1p, w2p, b2p


@jax.jit
def encoder_fc_medium(x_nchw, w1p, b1p, w2p, b2p):
    """x_nchw: (B, C, H, W) with C*H*W == 784. Returns (B, latent) float32."""
    B = x_nchw.shape[0]
    latent = w2p.shape[1]
    # nn.Flatten(start_dim=1) (row-major) + one-time bf16 cast of the activations.
    x_flat = x_nchw.reshape(B, IN_DIM).astype(jnp.bfloat16)

    # Batch tiling bounds VMEM independent of B (mandatory on v7x's 64 MiB VMEM);
    # at tiny B the whole batch is a single resident block.
    BT = B if B <= 512 else 256
    nb = pl.cdiv(B, BT)

    block_bytes = (BT * IN_DIM * 2                # x tile (bf16)
                   + IN_DIM * HID_TILE * 2        # w1 tile (bf16)
                   + N_HID_TILES * HID_TILE * 4   # b1 (resident, f32)
                   + HID_TILE * latent * 2        # w2 tile (bf16)
                   + latent * 4                   # b2 (resident, f32)
                   + BT * latent * 4)             # output tile (f32)
    vmem_limit = max(2 * block_bytes + (8 << 20), 16 << 20)

    cost = pl.CostEstimate(
        flops=2 * B * (IN_DIM * HID_PAD + HID_PAD * latent),
        transcendentals=0,
        bytes_accessed=(x_flat.size * 2 + w1p.size * 2 + w2p.size * 2
                        + b1p.size * 4 + b2p.size * 4 + B * latent * 4))

    return pl.pallas_call(
        _encoder_fc_kernel,
        out_shape=jax.ShapeDtypeStruct((B, latent), jnp.float32),
        grid=(nb, N_HID_TILES),
        in_specs=[
            pl.BlockSpec((BT, IN_DIM), lambda b, k: (b, 0)),                 # x tile
            pl.BlockSpec((None, IN_DIM, HID_TILE), lambda b, k: (k, 0, 0)),  # w1 tile (contiguous)
            pl.BlockSpec((N_HID_TILES, 1, HID_TILE), lambda b, k: (0, 0, 0)),  # b1 (resident)
            pl.BlockSpec((HID_TILE, latent), lambda b, k: (k, 0)),           # w2 row tile
            pl.BlockSpec((1, latent), lambda b, k: (0, 0)),                  # b2 (resident)
        ],
        out_specs=pl.BlockSpec((BT, latent), lambda b, k: (b, 0)),           # accumulator output
        compiler_params=pltpu.CompilerParams(
            dimension_semantics=("parallel", "arbitrary"),
            vmem_limit_bytes=vmem_limit),
        cost_estimate=cost,
    )(x_flat, w1p, b1p, w2p, b2p)


def _init_params(key, latent_dim=512):
    """Deterministic init matching nn.Linear shapes (stored as (in, out))."""
    k1, k2, k3, k4 = jax.random.split(key, 4)
    lim1 = 1.0 / jnp.sqrt(IN_DIM)
    lim2 = 1.0 / jnp.sqrt(HID_DIM)
    w1 = jax.random.uniform(k1, (IN_DIM, HID_DIM), jnp.float32, -lim1, lim1)
    b1 = jax.random.uniform(k2, (HID_DIM,), jnp.float32, -lim1, lim1)
    w2 = jax.random.uniform(k3, (HID_DIM, latent_dim), jnp.float32, -lim2, lim2)
    b2 = jax.random.uniform(k4, (latent_dim,), jnp.float32, -lim2, lim2)
    return w1, b1, w2, b2


if __name__ == "__main__":
    key = jax.random.PRNGKey(0)
    kx, kp = jax.random.split(key)

    # MNIST-like input shape implied by in_features = 784.
    B, C, H, W = 2, 1, 28, 28
    x = jax.random.normal(kx, (B, C, H, W), dtype=jnp.float32)

    latent_dim = 512
    w1, b1, w2, b2 = _init_params(kp, latent_dim)
    w1p, b1p, w2p, b2p = prepare_params(w1, b1, w2, b2)   # one-time prep

    out = jax.block_until_ready(encoder_fc_medium(x, w1p, b1p, w2p, b2p))

    # Pure-JAX reference of the same (bf16-weight / bf16-activation) math;
    # padded hidden lanes are exactly zero (ReLU(0+0)=0, zero w2 rows).
    x_flat = x.reshape(B, IN_DIM)
    xb = x_flat.astype(jnp.bfloat16).astype(jnp.float32)
    w1f = w1p.transpose(1, 0, 2).reshape(IN_DIM, HID_PAD).astype(jnp.float32)
    b1f = b1p.reshape(1, HID_PAD)
    h_ref = jnp.maximum(
        jnp.dot(xb, w1f, precision=jax.lax.Precision.HIGHEST) + b1f, 0.0)
    hb = h_ref.astype(jnp.bfloat16).astype(jnp.float32)
    ref = jnp.maximum(
        jnp.dot(hb, w2p.astype(jnp.float32),
                precision=jax.lax.Precision.HIGHEST) + b2p, 0.0)

    assert out.shape == (B, latent_dim)
    assert jnp.allclose(out, ref, atol=1e-3, rtol=1e-3), float(
        jnp.max(jnp.abs(out - ref)))

    print("KERNEL_OK")
</pallas_src>

<mosaic_0001>
module attributes {stable_mosaic.version = 11 : i64} {
  func.func @_encoder_fc_kernel(%arg0: i32, %arg1: i32, %arg2: memref<2x784xbf16, #tpu.memory_space<vmem>>, %arg3: memref<1x784x256xbf16, #tpu.memory_space<vmem>>, %arg4: memref<3x1x256xf32, #tpu.memory_space<vmem>>, %arg5: memref<256x512xbf16, #tpu.memory_space<vmem>>, %arg6: memref<1x512xf32, #tpu.memory_space<vmem>>, %arg7: memref<2x512xf32, #tpu.memory_space<vmem>>) attributes {dimension_semantics = [#tpu.dimension_semantics<parallel>, #tpu.dimension_semantics<arbitrary>], iteration_bounds = array<i64: 1, 3>, scalar_prefetch = 0 : i64, scratch_operands = 0 : i64, tpu.core_type = #tpu.core_type<tc>, window_params = [{transform_indices = @transform_0, window_bounds = array<i64: 2, 784>}, {transform_indices = @transform_1, window_bounds = array<i64: 1, 784, 256>}, {pipeline_mode = #tpu.pipeline_mode<synchronous>, transform_indices = @transform_2, window_bounds = array<i64: 3, 1, 256>}, {transform_indices = @transform_3, window_bounds = array<i64: 256, 512>}, {pipeline_mode = #tpu.pipeline_mode<synchronous>, transform_indices = @transform_4, window_bounds = array<i64: 1, 512>}, {transform_indices = @transform_5, window_bounds = array<i64: 2, 512>}]} {
    %c0 = arith.constant 0 : index
    %c0_0 = arith.constant 0 : index
    %0 = vector.load %arg2[%c0, %c0_0] : memref<2x784xbf16, #tpu.memory_space<vmem>>, vector<2x784xbf16>
    %c0_1 = arith.constant 0 : index
    %c0_2 = arith.constant 0 : index
    %c0_3 = arith.constant 0 : index
    %1 = vector.load %arg3[%c0_1, %c0_2, %c0_3] : memref<1x784x256xbf16, #tpu.memory_space<vmem>>, vector<1x784x256xbf16>
    %2 = vector.shape_cast %1 : vector<1x784x256xbf16> to vector<784x256xbf16>
    %cst = arith.constant dense<0.000000e+00> : vector<2x256xf32>
    %3 = tpu.matmul %0, %2, %cst {dimension_numbers = #tpu.dot_dimension_numbers<[1], [0], [0], [1], [0, 0, 1, 1], [], []>} : vector<2x784xbf16>, vector<784x256xbf16>, vector<2x256xf32> -> vector<2x256xf32>
    %4 = arith.index_cast %arg1 : i32 to index
    %c0_4 = arith.constant 0 : index
    %c0_5 = arith.constant 0 : index
    %5 = vector.load %arg4[%4, %c0_4, %c0_5] : memref<3x1x256xf32, #tpu.memory_space<vmem>>, vector<1x1x256xf32>
    %6 = vector.shape_cast %5 : vector<1x1x256xf32> to vector<1x256xf32>
    %7 = vector.broadcast %6 : vector<1x256xf32> to vector<2x256xf32>
    %8 = arith.addf %3, %7 : vector<2x256xf32>
    %cst_6 = arith.constant 0.000000e+00 : f32
    %9 = vector.broadcast %cst_6 : f32 to vector<2x256xf32>
    %10 = arith.maximumf %8, %9 : vector<2x256xf32>
    %11 = arith.truncf %10 : vector<2x256xf32> to vector<2x256xbf16>
    %c0_7 = arith.constant 0 : index
    %c0_8 = arith.constant 0 : index
    %12 = vector.load %arg5[%c0_7, %c0_8] : memref<256x512xbf16, #tpu.memory_space<vmem>>, vector<256x512xbf16>
    %cst_9 = arith.constant dense<0.000000e+00> : vector<2x512xf32>
    %13 = tpu.matmul %11, %12, %cst_9 {dimension_numbers = #tpu.dot_dimension_numbers<[1], [0], [0], [1], [0, 0, 1, 1], [], []>} : vector<2x256xbf16>, vector<256x512xbf16>, vector<2x512xf32> -> vector<2x512xf32>
    %c0_i32 = arith.constant 0 : i32
    %14 = arith.cmpi eq, %arg1, %c0_i32 : i32
    %15 = arith.extui %14 : i1 to i32
    %c0_i32_10 = arith.constant 0 : i32
    %16 = arith.cmpi ne, %15, %c0_i32_10 : i32
    scf.if %16 {
      %c0_14 = arith.constant 0 : index
      %c0_15 = arith.constant 0 : index
      %23 = vector.load %arg7[%c0_14, %c0_15] : memref<2x512xf32, #tpu.memory_space<vmem>>, vector<2x512xf32>
      tpu.vector_store %arg7[%c0_14, %c0_15], %13 {strides = array<i32>} : memref<2x512xf32, #tpu.memory_space<vmem>>, vector<2x512xf32>,
    } else {
    }
    %c0_i32_11 = arith.constant 0 : i32
    %17 = arith.cmpi ne, %arg1, %c0_i32_11 : i32
    %18 = arith.extui %17 : i1 to i32
    %c0_i32_12 = arith.constant 0 : i32
    %19 = arith.cmpi ne, %18, %c0_i32_12 : i32
    scf.if %19 {
      %c0_14 = arith.constant 0 : index
      %c0_15 = arith.constant 0 : index
      %23 = vector.load %arg7[%c0_14, %c0_15] : memref<2x512xf32, #tpu.memory_space<vmem>>, vector<2x512xf32>
      %24 = arith.addf %23, %13 : vector<2x512xf32>
      %c0_16 = arith.constant 0 : index
      %c0_17 = arith.constant 0 : index
      %25 = vector.load %arg7[%c0_16, %c0_17] : memref<2x512xf32, #tpu.memory_space<vmem>>, vector<2x512xf32>
      tpu.vector_store %arg7[%c0_16, %c0_17], %24 {strides = array<i32>} : memref<2x512xf32, #tpu.memory_space<vmem>>, vector<2x512xf32>,
    } else {
    }
    %c2_i32 = arith.constant 2 : i32
    %20 = arith.cmpi eq, %arg1, %c2_i32 : i32
    %21 = arith.extui %20 : i1 to i32
    %c0_i32_13 = arith.constant 0 : i32
    %22 = arith.cmpi ne, %21, %c0_i32_13 : i32
    scf.if %22 {
      %c0_14 = arith.constant 0 : index
      %c0_15 = arith.constant 0 : index
      %23 = vector.load %arg7[%c0_14, %c0_15] : memref<2x512xf32, #tpu.memory_space<vmem>>, vector<2x512xf32>
      %c0_16 = arith.constant 0 : index
      %c0_17 = arith.constant 0 : index
      %24 = vector.load %arg6[%c0_16, %c0_17] : memref<1x512xf32, #tpu.memory_space<vmem>>, vector<1x512xf32>
      %25 = vector.broadcast %24 : vector<1x512xf32> to vector<2x512xf32>
      %26 = arith.addf %23, %25 : vector<2x512xf32>
      %cst_18 = arith.constant 0.000000e+00 : f32
      %27 = vector.broadcast %cst_18 : f32 to vector<2x512xf32>
      %28 = arith.maximumf %26, %27 : vector<2x512xf32>
      %c0_19 = arith.constant 0 : index
      %c0_20 = arith.constant 0 : index
      %29 = vector.load %arg7[%c0_19, %c0_20] : memref<2x512xf32, #tpu.memory_space<vmem>>, vector<2x512xf32>
      tpu.vector_store %arg7[%c0_19, %c0_20], %28 {strides = array<i32>} : memref<2x512xf32, #tpu.memory_space<vmem>>, vector<2x512xf32>,
    } else {
    }
    return
  }
  func.func @transform_0(%arg0: i32, %arg1: i32) -> (i32, i32) {
    %c0_i32 = arith.constant 0 : i32
    %c0_i32_0 = arith.constant 0 : i32
    return %arg0, %c0_i32 : i32, i32
  }
  func.func @transform_1(%arg0: i32, %arg1: i32) -> (i32, i32, i32) {
    %c0_i32 = arith.constant 0 : i32
    %c0_i32_0 = arith.constant 0 : i32
    %c0_i32_1 = arith.constant 0 : i32
    return %arg1, %c0_i32, %c0_i32_0 : i32, i32, i32
  }
  func.func @transform_2(%arg0: i32, %arg1: i32) -> (i32, i32, i32) {
    %c0_i32 = arith.constant 0 : i32
    %c0_i32_0 = arith.constant 0 : i32
    %c0_i32_1 = arith.constant 0 : i32
    %c0_i32_2 = arith.constant 0 : i32
    return %c0_i32, %c0_i32_0, %c0_i32_1 : i32, i32, i32
  }
  func.func @transform_3(%arg0: i32, %arg1: i32) -> (i32, i32) {
    %c0_i32 = arith.constant 0 : i32
    %c0_i32_0 = arith.constant 0 : i32
    return %arg1, %c0_i32 : i32, i32
  }
  func.func @transform_4(%arg0: i32, %arg1: i32) -> (i32, i32) {
    %c0_i32 = arith.constant 0 : i32
    %c0_i32_0 = arith.constant 0 : i32
    %c0_i32_1 = arith.constant 0 : i32
    return %c0_i32, %c0_i32_0 : i32, i32
  }
  func.func @transform_5(%arg0: i32, %arg1: i32) -> (i32, i32) {
    %c0_i32 = arith.constant 0 : i32
    %c0_i32_0 = arith.constant 0 : i32
    return %arg0, %c0_i32 : i32, i32
  }
}

</mosaic_0001>

<bundles_post_ra>
// kernel: encoder_fc_medium.1
= control target key start
LH: loop header
LB: loop body
LE: loop exit
PB: predicated region body
PF: predicated region fallthrough
CT: control target
= control target key end

     0   :  { %s3126_s0 = inlined_call_operand.vmem [shape: bf16[2,784], index: 0, kind: input, shape index: {}]   ;;  %s3127_s1 = inlined_call_operand.hbm [shape: bf16[3,784,256], index: 1, kind: input, shape index: {}]   ;;  %s3128_s2 = inlined_call_operand.hbm [shape: f32[3,1,256], index: 2, kind: input, shape index: {}]   ;;  %s3129_s3 = inlined_call_operand.hbm [shape: bf16[768,512], index: 3, kind: input, shape index: {}]   ;;  %s3130_s4 = inlined_call_operand.hbm [shape: f32[1,512], index: 4, kind: input, shape index: {}]   ;;  %s3131_s5 = inlined_call_operand.hbm [shape: f32[2,512], index: 5, kind: output, shape index: {}]  }
   0x1   :  { %3140 = sst [smem:[#allocation17_spill]] %s3127_s1 }
   0x2   :  { %3141 = sst [smem:[#allocation18_spill]] %s3128_s2 }
   0x3   :  { %10 = vsyncpa [#allocation3], 0 }
   0x4   :  { %12 = vsyncpa [#allocation3 + $0x1], 0 }
   0x5   :  { %13 = vsyncpa [#allocation6], 0 }
   0x6   :  { %14 = vsyncpa [#allocation4], 0  ;;  %s2657_s18 = smov 0   ;;  %s2659_s19 = smov 0  }
   0x7   :  { %s2661_s20 = smov 0   ;;  %s2663_s21 = smov 0  }
   0x8   :  { %s2665_s22 = smov 0   ;;  %s2667_s23 = smov 0  }
   0x9 LB: > { %s2686_s24 = sadd.s32 4294967295, %s2609_s23   ;;  %p78_p0 = scmp.ne.s32.totalorder %s2593_s19, %s2589_s18  ;;  %s2609_s23 = sphi %s2667_s23, %s20_s23   ;;  %s2605_s22 = sphi %s2665_s22, %s3167_s22   ;;  %s2601_s21 = sphi %s2663_s21, %s3166_s21   ;;  %s2597_s20 = sphi %s2661_s20, %s3165_s20   ;;  %s2593_s19 = sphi %s2659_s19, %s3164_s19   ;;  %s2589_s18 = sphi %s2657_s18, %s3163_s18  }
   0xa   : > { %p3132_p1 = scmp.eq.s32.totalorder %s2686_s24, 0  ;;  %p1856_p2 = scmp.ge.s32.totalorder %s2609_s23, 1 }
   0xb   : > { %p183_p3 = scmp.lt.s32.totalorder %s2609_s23, 4  ;;  %s2611_s27 = smov [#allocation5]  }
   0xc   : > { %p2694_p4 = por %p3132_p1, %p78_p0  ;;  %s202_s28 = sshll.u32 %s2611_s27, 4  ;;  %s203_s28 = int_to_ptr.vmem [resolvable:$true] %s202_s28 }
   0xd   : > { %p2698_p5 = pnand %p1856_p2, %p183_p3  ;;  %s29_s30 = sadd.s32 1, %s2605_s22 }
   0xe   : > { %s3142_s25 = scalar_select %p2694_p4, 1, 0 }
   0xf   : > { %s3143_s26 = scalar_select %p2698_p5, 1, 0 }
  0x10   : > { %p2074_p6 = pneg %p2698_p5  ;;  %s3145_s2 = sld [smem:[#allocation18_spill]] }
  0x12   : > { %p2706_p7 = pnand %p2074_p6, %p3132_p1 }
  0x14   : > { %p3135_p9 = pneg %p2706_p7 }
  0x16   : > { %s2401_s8 = scalar_lea.hbm %s3145_s2, 96 }
  0x17   : > { %p2402_p8 = scmp.ne.s32.totalorder %s3145_s2, %s2401_s8  ;;  %p2408_p12 = scmp.lt.u32.totalorder %s2401_s8, %s3145_s2 }
  0x19   : > { %p2404_p10 = pnand %p3135_p9, %p2402_p8 }
  0x1b   : > { %p2405_p11 = pneg %p2404_p10 }
  0x1d   : > { %p2410_p13 = pnand %p2408_p12, %p2405_p11 }
  0x1f   : > { %2413 = shalt.err (!%p2410_p13)
}
  0x20   : > { %s2414_s13 = scalar_lea.vmem %s203_s28, 96  ;;  %p2422_p6 = scmp.lt.s32.totalorder %s203_s28, %s203_s28 }
  0x21   : > { %p2415_p0 = scmp.ne.s32.totalorder %s203_s28, %s2414_s13  ;;  %p2423_p1 = scmp.lt.s32.totalorder %s2414_s13, %s2414_s13 }
  0x23   : > { %p2417_p2 = pnand %p2415_p0, %p3135_p9  ;;  %p2424_p4 = por %p2423_p1, %p2422_p6 }
  0x25   : > { %p2418_p3 = pneg %p2417_p2 }
  0x27   : > { %p2425_p5 = pnand %p2424_p4, %p2418_p3 }
  0x29   : > { %2428 = shalt.err (!%p2425_p5)
}
  0x2a   : > { %s2612_s14 = smov 32   ;;  %s2613_s15 = smov 2  }
  0x2b   : > { %2077 = dma.hbm_to_vmem [thread:$0]  (!%p2706_p7), %s3145_s2, 96, %s203_s28, [#allocation6], %s2612_s14, %s2612_s14, %s2613_s15  }
  0x2c   : > { %p30_p1 = scmp.ge.s32.totalorder %s29_s30, 3  ;;  %s65_s18 = sadd.s32 1, %s2597_s20 }
  0x2d   : > { %p72_p4 = scmp.ne.s32.totalorder %s2597_s20, %s2593_s19  ;;  %p73_p5 = scmp.eq.s32.totalorder %s2609_s23, 0 }
  0x2e   : > { %s3169_s30 = smov (%p30_p1, %s29_s30), 0  ;;  %p2090_p10 = scmp.lt.s32.totalorder %s2609_s23, 3 }
  0x2f   : > { %3146 = sst [smem:[#allocation15_spill]] %s3169_s30  ;;  %p74_p8 = por %p73_p5, %p72_p4 }
  0x30   : > { %s62_s27 = ssub.s32 %s2605_s22, %s3169_s30  ;;  %s227_s6 = sand.u32 1, %s2609_s23  }
  0x31   : > { %p63_p11 = scmp.eq.s32.totalorder %s62_s27, 0  ;;  %s229_s7 = sand.u32 1, %s2597_s20  }
  0x32   : > { %s2056_s8 = smul.u32 12544, %s2605_s22  ;;  %s3148_s1 = sld [smem:[#allocation17_spill]] }
  0x33   : > { %s2746_s9 = scalar_select %p63_p11, %s2597_s20, %s65_s18  }
  0x34   : > { %s2055_s10 = smul.u32 784, %s229_s7  ;;  %p2753_p12 = pnand %p2090_p10, %p74_p8 }
  0x35   : > { %3147 = sst [smem:[#allocation16_spill]] %s2746_s9  ;;  %s2759_s16 = sshll.u32 %s229_s7, 9 }
  0x36   : > { %s3149_s13 = scalar_select %p2753_p12, 1, 0 }
  0x37   : > { %s231_s14 = scalar_lea.vmem [#allocation2], %s2055_s10  ;;  %s2761_s17 = scalar_lea.sflag [#allocation3], %s227_s6 }
  0x38   : > { %s2751_s28 = scalar_lea.hbm %s3148_s1, %s2056_s8  ;;  %s238_s15 = sshll.u32 %s231_s14, 4  ;;  %s2757_s15 = int_to_ptr.vmem [resolvable:$true] %s238_s15 }
  0x39   : > { %s2429_s18 = scalar_lea.hbm %s2751_s28, 12544  ;;  %p3137_p0 = pneg %p2753_p12 }
  0x3a   : > { %p2430_p13 = scmp.ne.s32.totalorder %s2751_s28, %s2429_s18  ;;  %s2434_s11 = scalar_lea.hbm %s3148_s1, 37632 }
  0x3b   : > { %p2435_p6 = scmp.lt.u32.totalorder %s2751_s28, %s3148_s1  ;;  %p2436_p1 = scmp.lt.u32.totalorder %s2434_s11, %s2429_s18 }
  0x3c   : > { %p2432_p2 = pnand %p3137_p0, %p2430_p13  ;;  %p2438_p5 = scmp.lt.u32.totalorder %s2429_s18, %s2751_s28 }
  0x3d   : > { %p2437_p4 = por %p2436_p1, %p2435_p6 }
  0x3e   : > { %p2433_p3 = pneg %p2432_p2 }
  0x3f   : > { %p2439_p8 = por %p2438_p5, %p2437_p4 }
  0x41   : > { %p2440_p10 = pnand %p2439_p8, %p2433_p3 }
  0x43   : > { %2443 = shalt.err (!%p2440_p10)
}
  0x44   : > { %s2444_s6 = scalar_lea.vmem %s2757_s15, 12544  ;;  %s2614_s7 = smov [#allocation2]  }
  0x45   : > { %p2445_p11 = scmp.ne.s32.totalorder %s2757_s15, %s2444_s6  ;;  %s2449_s14 = sshll.u32 %s2614_s7, 4  ;;  %s2450_s14 = int_to_ptr.vmem [resolvable:$false] %s2449_s14 }
  0x46   : > { %s2451_s27 = scalar_lea.vmem %s2450_s14, 25088  ;;  %p2452_p9 = scmp.lt.s32.totalorder %s2757_s15, %s2450_s14 }
  0x47   : > { %p2447_p13 = pnand %p2445_p11, %p3137_p0  ;;  %p2453_p6 = scmp.lt.s32.totalorder %s2451_s27, %s2444_s6 }
  0x49   : > { %p2448_p2 = pneg %p2447_p13  ;;  %p2454_p1 = por %p2453_p6, %p2452_p9 }
  0x4b   : > { %p2455_p4 = pnand %p2454_p1, %p2448_p2 }
  0x4d   : > { %2458 = shalt.err (!%p2455_p4)
}
  0x4e   : > { %s2615_s18 = smov 128   ;;  %s2616_s8 = smov 8  }
  0x4f   : > { %2084 = dma.hbm_to_vmem [thread:$0]  (!%p2753_p12), %s2751_s28, 12544, %s2757_s15, %s2761_s17, %s2615_s18, %s2615_s18, %s2616_s8  }
  0x50   : > { %s2617_s11 = smov [#allocation8]   ;;  %s2042_s12 = sshll.u32 %s2605_s22, 13 }
  0x51   : > { %s216_s10 = sshll.u32 %s2617_s11, 4  ;;  %s2793_s6 = scalar_lea.hbm %s3129_s3, %s2042_s12  ;;  %s217_s10 = int_to_ptr.vmem [resolvable:$true] %s216_s10 }
  0x52   : > { %s2459_s2 = scalar_lea.hbm %s3130_s4, 64  ;;  %p3150_p3 = pneg %p2706_p7 }
  0x53   : > { %p2460_p9 = scmp.ne.s32.totalorder %s3130_s4, %s2459_s2  ;;  %p2466_p10 = scmp.lt.u32.totalorder %s2459_s2, %s3130_s4 }
  0x55   : > { %p2462_p5 = pnand %p2460_p9, %p3150_p3 }
  0x57   : > { %p2463_p8 = pneg %p2462_p5 }
  0x59   : > { %p2468_p11 = pnand %p2466_p10, %p2463_p8 }
  0x5b   : > { %2471 = shalt.err (!%p2468_p11)
}
  0x5c   : > { %s2472_s18 = scalar_lea.vmem %s217_s10, 64  ;;  %p3151_p2 = pmov %p3150_p3 }
  0x5d   : > { %p2473_p13 = scmp.ne.s32.totalorder %s217_s10, %s2472_s18  ;;  %p2480_p4 = scmp.lt.s32.totalorder %s217_s10, %s217_s10 }
  0x5e   : > { %p2481_p0 = scmp.lt.s32.totalorder %s2472_s18, %s2472_s18 }
  0x5f   : > { %p2475_p6 = pnand %p2473_p13, %p3151_p2 }
  0x60   : > { %p2482_p12 = por %p2481_p0, %p2480_p4 }
  0x61   : > { %p2476_p1 = pneg %p2475_p6 }
  0x63   : > { %p2483_p3 = pnand %p2482_p12, %p2476_p1 }
  0x65   : > { %2486 = shalt.err (!%p2483_p3)
}
  0x66   : > { %2080 = dma.hbm_to_vmem [thread:$0]  (!%p2706_p7), %s3130_s4, 64, %s217_s10, [#allocation6]  }
  0x67   : > { %s252_s2 = scalar_lea.vmem [#allocation7], %s2759_s16  ;;  %s2487_s8 = scalar_lea.hbm %s2793_s6, 8192 }
  0x68   : > { %s260_s9 = sshll.u32 %s252_s2, 4  ;;  %p2488_p0 = scmp.ne.s32.totalorder %s2793_s6, %s2487_s8  ;;  %s2816_s9 = int_to_ptr.vmem [resolvable:$true] %s260_s9 }
  0x69   : > { %p3152_p12 = scmp.ne.s32.totalorder %s3149_s13, 0  ;;  %s2492_s12 = scalar_lea.hbm %s3129_s3, 24576 }
  0x6a   : > { %p2493_p10 = scmp.lt.u32.totalorder %s2793_s6, %s3129_s3  ;;  %p2494_p11 = scmp.lt.u32.totalorder %s2492_s12, %s2487_s8 }
  0x6b   : > { %p3153_p9 = pneg %p3152_p12  ;;  %p2496_p13 = scmp.lt.u32.totalorder %s2487_s8, %s2793_s6 }
  0x6c   : > { %p2495_p7 = por %p2494_p11, %p2493_p10 }
  0x6d   : > { %p2490_p5 = pnand %p2488_p0, %p3153_p9 }
  0x6e   : > { %p2497_p2 = por %p2496_p13, %p2495_p7 }
  0x6f   : > { %p2491_p8 = pneg %p2490_p5 }
  0x71   : > { %p2498_p6 = pnand %p2497_p2, %p2491_p8 }
  0x73   : > { %2501 = shalt.err (!%p2498_p6)
}
  0x74   : > { %s2502_s16 = scalar_lea.vmem %s2816_s9, 8192  ;;  %p3154_p4 = pmov %p3153_p9 }
  0x75   : > { %p2503_p1 = scmp.ne.s32.totalorder %s2816_s9, %s2502_s16  ;;  %s2618_s10 = smov [#allocation7]  }
  0x76   : > { %s2507_s27 = sshll.u32 %s2618_s10, 4  ;;  %s2508_s27 = int_to_ptr.vmem [resolvable:$false] %s2507_s27 }
  0x77   : > { %p2505_p3 = pnand %p2503_p1, %p3154_p4  ;;  %s2509_s28 = scalar_lea.vmem %s2508_s27, 16384 }
  0x78   : > { %p2510_p9 = scmp.lt.s32.totalorder %s2816_s9, %s2508_s27  ;;  %p2511_p5 = scmp.lt.s32.totalorder %s2509_s28, %s2502_s16 }
  0x79   : > { %p2506_p0 = pneg %p2505_p3 }
  0x7a   : > { %p2512_p10 = por %p2511_p5, %p2510_p9 }
  0x7c   : > { %p2513_p11 = pnand %p2512_p10, %p2506_p0 }
  0x7e   : > { %2516 = shalt.err (!%p2513_p11)
}
  0x7f   : > { %s2619_s15 = smov 256   ;;  %s2620_s18 = smov 16  }
  0x80   : > { %2087 = dma.hbm_to_vmem [thread:$0]  (!%p3152_p12), %s2793_s6, 8192, %s2816_s9, %s2761_s17, %s2619_s15, %s2619_s15, %s2620_s18  }
  0x81   : > { %p3155_p8 = scmp.ne.s32.totalorder %s3143_s26, 0 }
  0x82   : > { %s274_s1 = sand.u32 (!%p3155_p8), 1, %s2686_s24   ;;  %s276_s30 = sand.u32 (!%p3155_p8), 1, %s2593_s19  }
  0x83   : > { %272 = sbr.rel (%p3155_p8) target bundleno = 850 (0x352), region = 40  ;;  %s275_s8 = scalar_lea.sflag (!%p3155_p8), [#allocation3], %s274_s1 }
  0x84   : > { %s2057_s2 = smul.u32 (!%p3155_p8), 784, %s276_s30  ;;  %p3156_p7 = scmp.ne.s32.totalorder (!%p3155_p8), %s3142_s25, 0 }
  0x86   : > { %s2846_s29 = scalar_lea.vmem (!%p3155_p8), [#allocation2], %s2057_s2 }
  0x8a   : > { %2568 = dma.done.wait (%p3156_p7), %s275_s8, 12544  }
  0x8b   : > { %2570 = vsyncadd (%p3156_p7), %s275_s8, 4294954752  ;;  %p3157_p13 = scmp.eq.s32.totalorder %s2686_s24, 0 }
  0x8d   : > { %2572 = dma.done.wait (%p3157_p13), [#allocation6], 96   ;;  %p3158_p12 = pmov %p3157_p13 }
  0x8e   : > { %s1868_s26 = sshll.u32 %s276_s30, 9 }
  0x8f   : > { %2574 = vsyncadd (%p3158_p12), [#allocation6], 4294967200  ;;  %s2856_s13 = scalar_lea.vmem [#allocation7], %s1868_s26 }
  0x90   : > { %2576 = dma.done.wait (%p3156_p7), %s275_s8, 8192  }
  0x91   : > { %2578 = vsyncadd (%p3156_p7), %s275_s8, 4294959104  ;;  %p3159_p2 = pmov %p3158_p12 }
  0x93   : > { %2580 = dma.done.wait (%p3159_p2), [#allocation6], 64   ;;  %p3160_p6 = pmov %p3159_p2 }
  0x94   : > { %v2157_v0 = vld [vmem:[%s2846_s29 + $0x104] ss:$8 sps:$4 sm:$0xff]   ;;  %v2159_v1 = vld [vmem:[%s2846_s29 + $0x100] ss:$8 sps:$4 sm:$0xff]   ;;  %v2160_v2 = vld [vmem:[%s2846_s29 + $0x114] ss:$8 sps:$4 sm:$0xff]   ;;  %v435_v7 = vlaneseq }
  0x95   : > { %2582 = vsyncadd (%p3160_p6), [#allocation6], 4294967232  ;;  %1035 = vmatprep.subr.bf16.mxu0 %v2157_v0  ;;  %v2162_v3 = vld [vmem:[%s2846_s29 + $0x110] ss:$8 sps:$4 sm:$0xff]   ;;  %v2163_v4 = vld [vmem:[%s2846_s29 + $0x124] ss:$8 sps:$4 sm:$0xff]  }
  0x96   : > { %1036 = vmatpush1.bf16.msra.mxu0 %v2159_v1  ;;  %v2165_v5 = vld [vmem:[%s2846_s29 + $0x120] ss:$8 sps:$4 sm:$0xff]   ;;  %v2166_v6 = vld [vmem:[%s2846_s29 + $0x134] ss:$8 sps:$4 sm:$0xff]   ;;  %v2621_v8 = vmov 1966171168  }
  0x97   : > { %1037 = vmatprep.subr.bf16.mxu0 %v2160_v2  ;;  %v448_v9 = vunpack.c.l.s4 %v2621_v8  ;;  %v2168_v10 = vld [vmem:[%s2846_s29 + $0x130] ss:$8 sps:$4 sm:$0xff]   ;;  %v2169_v11 = vld [vmem:[%s2846_s29 + $0x144] ss:$8 sps:$4 sm:$0xff]   ;;  %v2875_v12 = vshrl.u32 %v435_v7, 7  ;;  %vm990_vm0 = vcmask 130048  }
  0x98   : > { %v2171_v14 = vld [vmem:[%s2846_s29 + $0x140] ss:$8 sps:$4 sm:$0xff]   ;;  %v2172_v15 = vld [vmem:[%s2846_s29 + $0x154] ss:$8 sps:$4 sm:$0xff]   ;;  %v2174_v17 = vld [vmem:[%s2846_s29 + $0x150] ss:$8 sps:$4 sm:$0xff]  }
  0x99   : > { %v449_v13 = vunpack.c.0.s8 %v448_v9  ;;  %v2175_v18 = vld [vmem:[%s2846_s29 + $0x164] ss:$8 sps:$4 sm:$0xff]   ;;  %v2177_v22 = vld [vmem:[%s2846_s29 + $0x160] ss:$8 sps:$4 sm:$0xff]   ;;  %v2178_v23 = vld [vmem:[%s2846_s29 + $0x174] ss:$8 sps:$4 sm:$0xff]  }
  0x9a   : > { %1038 = vmatpush1.bf16.msra.mxu0 %v2162_v3  ;;  %v332_v19 = vld [vmem:[%s3126_s0] sm:$0x7f]  ;;  %s1870_s6 = sshll.u32 %s2601_s21, 1  ;;  %p2034_p1 = scmp.ne.s32.totalorder %s2601_s21, 0 }
  0x9b   : > { %1039 = vmatprep.subr.bf16.mxu0 %v2163_v4  ;;  %v2880_v16 = vsub.s32 %v449_v13, %v2875_v12  ;;  %v446_v20 = vcombine.high %v332_v19, %v332_v19  ;;  %v2212_v26 = vld [vmem:[%s2846_s29 + $0x4] ss:$8 sps:$4 sm:$0xff]   ;;  %v2180_v27 = vld [vmem:[%s2846_s29 + $0x170] ss:$8 sps:$4 sm:$0xff]   ;;  %v2217_v29 = vld [vmem:[%s2846_s29] ss:$8 sps:$4 sm:$0xff]  }
  0x9c   : > { %994 = vmatprep.subr.bf16.mxu1 %v2212_v26  ;;  %v2218_v31 = vld [vmem:[%s2846_s29 + $0x14] ss:$8 sps:$4 sm:$0xff]   ;;  %v2181_v32 = vld [vmem:[%s2846_s29 + $0x184] ss:$8 sps:$4 sm:$0xff]   ;;  %v2223_v34 = vld [vmem:[%s2846_s29 + $0x10] ss:$8 sps:$4 sm:$0xff]  }
  0x9d   : > { %v2888_v21 = vrot.slane %v332_v19, %v2880_v16  ;;  %v2895_v25 = vrot.slane %v446_v20, %v2880_v16  ;;  %995 = vmatpush1.bf16.msra.mxu1 %v2217_v29  ;;  %v2224_v35 = vld [vmem:[%s2846_s29 + $0x24] ss:$8 sps:$4 sm:$0xff]   ;;  %v2183_v36 = vld [vmem:[%s2846_s29 + $0x180] ss:$8 sps:$4 sm:$0xff]   ;;  %v2184_v37 = vld [vmem:[%s2846_s29 + $0x194] ss:$8 sps:$4 sm:$0xff]  }
  0x9e   : > { %1040 = vmatpush1.bf16.msra.mxu0 %v2165_v5  ;;  %996 = vmatprep.subr.bf16.mxu1 %v2218_v31  ;;  %v2229_v38 = vld [vmem:[%s2846_s29 + $0x20] ss:$8 sps:$4 sm:$0xff]   ;;  %v2230_v39 = vld [vmem:[%s2846_s29 + $0x34] ss:$8 sps:$4 sm:$0xff]   ;;  %v2186_v40 = vld [vmem:[%s2846_s29 + $0x190] ss:$8 sps:$4 sm:$0xff]  }
  0x9f   : > { %1041 = vmatprep.subr.bf16.mxu0 %v2166_v6  ;;  %v461_v24 = vcombine.high %v2888_v21, %v2888_v21  ;;  %v2903_v30 = vrot.slane %v2895_v25, %v2880_v16  ;;  %v2187_v41 = vld [vmem:[%s2846_s29 + $0x1a4] ss:$8 sps:$4 sm:$0xff]   ;;  %v2235_v42 = vld [vmem:[%s2846_s29 + $0x30] ss:$8 sps:$4 sm:$0xff]   ;;  %v2189_v44 = vld [vmem:[%s2846_s29 + $0x1a0] ss:$8 sps:$4 sm:$0xff]   ;;  %v2940_v1 = vrot.slane %v2888_v21, %v2880_v16  ;;  %v462_v3 = vcombine.high %v2895_v25, %v2895_v25 }
  0xa0   : > { %v2236_v43 = vld [vmem:[%s2846_s29 + $0x44] ss:$8 sps:$4 sm:$0xff]   ;;  %v2190_v45 = vld [vmem:[%s2846_s29 + $0x1b4] ss:$8 sps:$4 sm:$0xff]   ;;  %v2241_v46 = vld [vmem:[%s2846_s29 + $0x40] ss:$8 sps:$4 sm:$0xff]  }
  0xa1   : > { %v483_v28 = vrot.slane %v461_v24, %v2880_v16  ;;  %997 = vmatpush1.bf16.msra.mxu1 %v2223_v34  ;;  %v2242_v47 = vld [vmem:[%s2846_s29 + $0x54] ss:$8 sps:$4 sm:$0xff]   ;;  %v2192_v48 = vld [vmem:[%s2846_s29 + $0x1b0] ss:$8 sps:$4 sm:$0xff]   ;;  %v2193_v49 = vld [vmem:[%s2846_s29 + $0x1c4] ss:$8 sps:$4 sm:$0xff]   ;;  %v491_v6 = vcombine.high %v2940_v1, %v2940_v1  ;;  %v490_v9 = vrot.slane %v462_v3, %v2880_v16 }
  0xa2   : > { %1042 = vmatpush1.bf16.msra.mxu0 %v2168_v10  ;;  %998 = vmatprep.subr.bf16.mxu1 %v2224_v35  ;;  %v2247_v50 = vld [vmem:[%s2846_s29 + $0x50] ss:$8 sps:$4 sm:$0xff]   ;;  %v2248_v51 = vld [vmem:[%s2846_s29 + $0x64] ss:$8 sps:$4 sm:$0xff]   ;;  %v2195_v52 = vld [vmem:[%s2846_s29 + $0x1c0] ss:$8 sps:$4 sm:$0xff]  }
  0xa3   : > { %1043 = vmatprep.subr.bf16.mxu0 %v2169_v11  ;;  %v493_v33 = vcombine.high %v483_v28, %v483_v28  ;;  %1026 = vmatprep.mubr.bf16.mxu1 %v483_v28  ;;  %v2196_v53 = vld [vmem:[%s2846_s29 + $0x1d4] ss:$8 sps:$4 sm:$0xff]   ;;  %v2253_v54 = vld [vmem:[%s2846_s29 + $0x60] ss:$8 sps:$4 sm:$0xff]   ;;  %v2198_v56 = vld [vmem:[%s2846_s29 + $0x1d0] ss:$8 sps:$4 sm:$0xff]  }
  0xa4   : > { %v2254_v55 = vld [vmem:[%s2846_s29 + $0x74] ss:$8 sps:$4 sm:$0xff]   ;;  %v2199_v57 = vld [vmem:[%s2846_s29 + $0x1e4] ss:$8 sps:$4 sm:$0xff]   ;;  %v2259_v58 = vld [vmem:[%s2846_s29 + $0x70] ss:$8 sps:$4 sm:$0xff]  }
  0xa5   : > { %1067 = vmatprep.mubr.bf16.mxu0 %v493_v33  ;;  %999 = vmatpush1.bf16.msra.mxu1 %v2229_v38  ;;  %v2260_v59 = vld [vmem:[%s2846_s29 + $0x84] ss:$8 sps:$4 sm:$0xff]   ;;  %v2201_v60 = vld [vmem:[%s2846_s29 + $0x1e0] ss:$8 sps:$4 sm:$0xff]   ;;  %v2202_v61 = vld [vmem:[%s2846_s29 + $0x1f4] ss:$8 sps:$4 sm:$0xff]  }
  0xa6   : > { %1044 = vmatpush1.bf16.msra.mxu0 %v2171_v14  ;;  %1000 = vmatprep.subr.bf16.mxu1 %v2230_v39  ;;  %v2265_v62 = vld [vmem:[%s2846_s29 + $0x80] ss:$8 sps:$4 sm:$0xff]   ;;  %v2266_v63 = vld [vmem:[%s2846_s29 + $0x94] ss:$8 sps:$4 sm:$0xff]   ;;  %v2204_v0 = vld [vmem:[%s2846_s29 + $0x1f0] ss:$8 sps:$4 sm:$0xff]  }
  0xa7   : > { %1045 = vmatprep.subr.bf16.mxu0 %v2172_v15  ;;  %v2208_v2 = vld [vmem:[%s2846_s29 + $0x204] ss:$8 sps:$4 sm:$0xff]   ;;  %v2271_v4 = vld [vmem:[%s2846_s29 + $0x90] ss:$8 sps:$4 sm:$0xff]   ;;  %v2206_v7 = vld [vmem:[%s2846_s29 + $0x200] ss:$8 sps:$4 sm:$0xff]  }
  0xa8   : > { %v2272_v5 = vld [vmem:[%s2846_s29 + $0xa4] ss:$8 sps:$4 sm:$0xff]   ;;  %v2211_v8 = vld [vmem:[%s2846_s29 + $0x214] ss:$8 sps:$4 sm:$0xff]   ;;  %v2277_v10 = vld [vmem:[%s2846_s29 + $0xa0] ss:$8 sps:$4 sm:$0xff]  }
  0xa9   : > { %1001 = vmatpush1.bf16.msra.mxu1 %v2235_v42  ;;  %v2278_v11 = vld [vmem:[%s2846_s29 + $0xb4] ss:$8 sps:$4 sm:$0xff]   ;;  %v2209_v13 = vld [vmem:[%s2846_s29 + $0x210] ss:$8 sps:$4 sm:$0xff]   ;;  %v2216_v14 = vld [vmem:[%s2846_s29 + $0x224] ss:$8 sps:$4 sm:$0xff]  }
  0xaa   : > { %1046 = vmatpush1.bf16.msra.mxu0 %v2174_v17  ;;  %1002 = vmatprep.subr.bf16.mxu1 %v2236_v43  ;;  %v2283_v15 = vld [vmem:[%s2846_s29 + $0xb0] ss:$8 sps:$4 sm:$0xff]   ;;  %v2284_v16 = vld [vmem:[%s2846_s29 + $0xc4] ss:$8 sps:$4 sm:$0xff]   ;;  %v2214_v17 = vld [vmem:[%s2846_s29 + $0x220] ss:$8 sps:$4 sm:$0xff]  }
  0xab   : > { %1047 = vmatprep.subr.bf16.mxu0 %v2175_v18  ;;  %v2222_v18 = vld [vmem:[%s2846_s29 + $0x234] ss:$8 sps:$4 sm:$0xff]   ;;  %v2289_v19 = vld [vmem:[%s2846_s29 + $0xc0] ss:$8 sps:$4 sm:$0xff]   ;;  %v2220_v21 = vld [vmem:[%s2846_s29 + $0x230] ss:$8 sps:$4 sm:$0xff]  }
  0xac   : > { %v2290_v20 = vld [vmem:[%s2846_s29 + $0xd4] ss:$8 sps:$4 sm:$0xff]   ;;  %v2296_v24 = vld [vmem:[%s2846_s29 + $0xe4] ss:$8 sps:$4 sm:$0xff]   ;;  %v2226_v25 = vld [vmem:[%s2846_s29 + $0x240] ss:$8 sps:$4 sm:$0xff]  }
  0xad   : > { %1003 = vmatpush1.bf16.msra.mxu1 %v2241_v46  ;;  %v2234_v26 = vld [vmem:[%s2846_s29 + $0x254] ss:$8 sps:$4 sm:$0xff]   ;;  %v2232_v28 = vld [vmem:[%s2846_s29 + $0x250] ss:$8 sps:$4 sm:$0xff]   ;;  %v2240_v31 = vld [vmem:[%s2846_s29 + $0x264] ss:$8 sps:$4 sm:$0xff]  }
  0xae   : > { %1048 = vmatpush1.bf16.msra.mxu0 %v2177_v22  ;;  %1004 = vmatprep.subr.bf16.mxu1 %v2242_v47  ;;  %v2228_v22 = vld [vmem:[%s2846_s29 + $0x244] ss:$8 sps:$4 sm:$0xff]   ;;  %v2302_v29 = vld [vmem:[%s2846_s29 + $0xf4] ss:$8 sps:$4 sm:$0xff]   ;;  %v2238_v34 = vld [vmem:[%s2846_s29 + $0x260] ss:$8 sps:$4 sm:$0xff]  }
  0xaf   : > { %1049 = vmatprep.subr.bf16.mxu0 %v2178_v23  ;;  %v2295_v23 = vld [vmem:[%s2846_s29 + $0xd0] ss:$8 sps:$4 sm:$0xff]   ;;  %v2246_v35 = vld [vmem:[%s2846_s29 + $0x274] ss:$8 sps:$4 sm:$0xff]   ;;  %v2252_v39 = vld [vmem:[%s2846_s29 + $0x284] ss:$8 sps:$4 sm:$0xff]  }
  0xb0   : > { %v2307_v33 = vld [vmem:[%s2856_s13 + $0x4] ss:$16 sps:$4 sm:$0xff]   ;;  %s432_s9 = scalar_lea.vmem [#allocation5], %s1870_s6 }
  0xb1   : > { %1005 = vmatpush1.bf16.msra.mxu1 %v2247_v50  ;;  %v2244_v38 = vld [vmem:[%s2846_s29 + $0x270] ss:$8 sps:$4 sm:$0xff]   ;;  %v2250_v42 = vld [vmem:[%s2846_s29 + $0x280] ss:$8 sps:$4 sm:$0xff]   ;;  %v2258_v43 = vld [vmem:[%s2846_s29 + $0x294] ss:$8 sps:$4 sm:$0xff]  }
  0xb2   : > { %1050 = vmatpush1.bf16.msra.mxu0 %v2180_v27  ;;  %1006 = vmatprep.subr.bf16.mxu1 %v2248_v51  ;;  %v2301_v27 = vld [vmem:[%s2846_s29 + $0xe0] ss:$8 sps:$4 sm:$0xff]   ;;  %v2256_v46 = vld [vmem:[%s2846_s29 + $0x290] ss:$8 sps:$4 sm:$0xff]   ;;  %v2264_v47 = vld [vmem:[%s2846_s29 + $0x2a4] ss:$8 sps:$4 sm:$0xff]  }
  0xb3   : > { %1051 = vmatprep.subr.bf16.mxu0 %v2181_v32  ;;  %v2304_v32 = vld [vmem:[%s2846_s29 + $0xf0] ss:$8 sps:$4 sm:$0xff]   ;;  %v2262_v50 = vld [vmem:[%s2846_s29 + $0x2a0] ss:$8 sps:$4 sm:$0xff]   ;;  %v2270_v51 = vld [vmem:[%s2846_s29 + $0x2b4] ss:$8 sps:$4 sm:$0xff]  }
  0xb4   : > { %v2294_v3 = vld [vmem:[%s2846_s29 + $0x2f4] ss:$8 sps:$4 sm:$0xff]  }
  0xb5   : > { %1007 = vmatpush1.bf16.msra.mxu1 %v2253_v54  ;;  %v2268_v54 = vld [vmem:[%s2846_s29 + $0x2b0] ss:$8 sps:$4 sm:$0xff]  }
  0xb6   : > { %1052 = vmatpush1.bf16.msra.mxu0 %v2183_v36  ;;  %1008 = vmatprep.subr.bf16.mxu1 %v2254_v55  ;;  %v2305_v36 = vld [vmem:[%s2856_s13] ss:$16 sps:$4 sm:$0xff]  }
  0xb7   : > { %1053 = vmatprep.subr.bf16.mxu0 %v2184_v37  ;;  %v2310_v37 = vld [vmem:[%s2856_s13 + $0x24] ss:$16 sps:$4 sm:$0xff]  }
  0xb8   : > { %v2276_v55 = vld [vmem:[%s2846_s29 + $0x2c4] ss:$8 sps:$4 sm:$0xff]  }
  0xb9   : > { %1009 = vmatpush1.bf16.msra.mxu1 %v2259_v58  ;;  %v2274_v58 = vld [vmem:[%s2846_s29 + $0x2c0] ss:$8 sps:$4 sm:$0xff]  }
  0xba   : > { %1054 = vmatpush1.bf16.msra.mxu0 %v2186_v40  ;;  %1010 = vmatprep.subr.bf16.mxu1 %v2260_v59  ;;  %v2308_v40 = vld [vmem:[%s2856_s13 + $0x20] ss:$16 sps:$4 sm:$0xff]  }
  0xbb   : > { %1055 = vmatprep.subr.bf16.mxu0 %v2187_v41  ;;  %v2313_v41 = vld [vmem:[%s2856_s13 + $0x44] ss:$16 sps:$4 sm:$0xff]  }
  0xbc   : > { %v2282_v59 = vld [vmem:[%s2846_s29 + $0x2d4] ss:$8 sps:$4 sm:$0xff]  }
  0xbd   : > { %1011 = vmatpush1.bf16.msra.mxu1 %v2265_v62  ;;  %v2280_v62 = vld [vmem:[%s2846_s29 + $0x2d0] ss:$8 sps:$4 sm:$0xff]  }
  0xbe   : > { %1056 = vmatpush1.bf16.msra.mxu0 %v2189_v44  ;;  %1012 = vmatprep.subr.bf16.mxu1 %v2266_v63  ;;  %v2311_v44 = vld [vmem:[%s2856_s13 + $0x40] ss:$16 sps:$4 sm:$0xff]  }
  0xbf   : > { %1057 = vmatprep.subr.bf16.mxu0 %v2190_v45  ;;  %v2316_v45 = vld [vmem:[%s2856_s13 + $0x64] ss:$16 sps:$4 sm:$0xff]  }
  0xc0   : > { %v2288_v63 = vld [vmem:[%s2846_s29 + $0x2e4] ss:$8 sps:$4 sm:$0xff]  }
  0xc1   : > { %1013 = vmatpush1.bf16.msra.mxu1 %v2271_v4  ;;  %v2329_v4 = vld [vmem:[%s2856_s13 + $0x100] ss:$16 sps:$4 sm:$0xff]  }
  0xc2   : > { %1058 = vmatpush1.bf16.msra.mxu0 %v2192_v48  ;;  %1014 = vmatprep.subr.bf16.mxu1 %v2272_v5  ;;  %v2314_v48 = vld [vmem:[%s2856_s13 + $0x60] ss:$16 sps:$4 sm:$0xff]   ;;  %v2334_v5 = vld [vmem:[%s2856_s13 + $0x124] ss:$16 sps:$4 sm:$0xff]  }
  0xc3   : > { %1059 = vmatprep.subr.bf16.mxu0 %v2193_v49  ;;  %v2319_v49 = vld [vmem:[%s2856_s13 + $0x84] ss:$16 sps:$4 sm:$0xff]  }
  0xc5   : > { %1015 = vmatpush1.bf16.msra.mxu1 %v2277_v10  ;;  %v2298_v10 = vld [vmem:[%s2846_s29 + $0x300] ss:$8 sps:$4 sm:$0xff]  }
  0xc6   : > { %1060 = vmatpush1.bf16.msra.mxu0 %v2195_v52  ;;  %1016 = vmatprep.subr.bf16.mxu1 %v2278_v11  ;;  %v2317_v52 = vld [vmem:[%s2856_s13 + $0x80] ss:$16 sps:$4 sm:$0xff]  }
  0xc7   : > { %1061 = vmatprep.subr.bf16.mxu0 %v2196_v53  ;;  %v2322_v53 = vld [vmem:[%s2856_s13 + $0xa4] ss:$16 sps:$4 sm:$0xff]   ;;  %v2335_v11 = vld [vmem:[%s2856_s13 + $0x140] ss:$16 sps:$4 sm:$0xff]  }
  0xc9   : > { %1017 = vmatpush1.bf16.msra.mxu1 %v2283_v15  ;;  %v2338_v15 = vld [vmem:[%s2856_s13 + $0x160] ss:$16 sps:$4 sm:$0xff]  }
  0xca   : > { %1062 = vmatpush1.bf16.msra.mxu0 %v2198_v56  ;;  %1018 = vmatprep.subr.bf16.mxu1 %v2284_v16  ;;  %v2320_v56 = vld [vmem:[%s2856_s13 + $0xa0] ss:$16 sps:$4 sm:$0xff]   ;;  %v2343_v16 = vld [vmem:[%s2856_s13 + $0x184] ss:$16 sps:$4 sm:$0xff]  }
  0xcb   : > { %1063 = vmatprep.subr.bf16.mxu0 %v2199_v57  ;;  %v2325_v57 = vld [vmem:[%s2856_s13 + $0xc4] ss:$16 sps:$4 sm:$0xff]  }
  0xcd   : > { %1019 = vmatpush1.bf16.msra.mxu1 %v2289_v19  ;;  %v2344_v19 = vld [vmem:[%s2856_s13 + $0x1a0] ss:$16 sps:$4 sm:$0xff]  }
  0xce   : > { %1064 = vmatpush1.bf16.msra.mxu0 %v2201_v60  ;;  %1020 = vmatprep.subr.bf16.mxu1 %v2290_v20  ;;  %v2323_v60 = vld [vmem:[%s2856_s13 + $0xc0] ss:$16 sps:$4 sm:$0xff]   ;;  %v2346_v20 = vld [vmem:[%s2856_s13 + $0x1a4] ss:$16 sps:$4 sm:$0xff]  }
  0xcf   : > { %1065 = vmatprep.subr.bf16.mxu0 %v2202_v61  ;;  %v2328_v61 = vld [vmem:[%s2856_s13 + $0xe4] ss:$16 sps:$4 sm:$0xff]  }
  0xd1   : > { %1021 = vmatpush1.bf16.msra.mxu1 %v2295_v23  ;;  %v2352_v23 = vld [vmem:[%s2856_s13 + $0x1e4] ss:$16 sps:$4 sm:$0xff]  }
  0xd2   : > { %1066 = vmatpush1.bf16.msra.mxu0 %v2204_v0  ;;  %1022 = vmatprep.subr.bf16.mxu1 %v2296_v24  ;;  %v2326_v0 = vld [vmem:[%s2856_s13 + $0xe0] ss:$16 sps:$4 sm:$0xff]  }
  0xd3   : > { %1076 = vmatprep.subr.bf16.mxu0 %v2208_v2  ;;  %v2286_v2 = vld [vmem:[%s2846_s29 + $0x2e0] ss:$8 sps:$4 sm:$0xff]  }
  0xd4   : > { %v2350_v24 = vld [vmem:[%s2856_s13 + $0x1e0] ss:$16 sps:$4 sm:$0xff]  }
  0xd5   : > { %1068 = vmatmul.mubr.bf16.vlgmr.msra.gmra.mrb[0].mxu0 %v491_v6  ;;  %1023 = vmatpush1.bf16.msra.mxu1 %v2301_v27  ;;  %v2292_v6 = vld [vmem:[%s2846_s29 + $0x2f0] ss:$8 sps:$4 sm:$0xff]  }
  0xd6   : > { %1077 = vmatpush1.bf16.msra.mxu0 %v2206_v7  ;;  %1108 = vmatprep.mubr.bf16.mxu0 %v490_v9  ;;  %v2300_v7 = vld [vmem:[%s2846_s29 + $0x304] ss:$8 sps:$4 sm:$0xff]  }
  0xd7   : > { %1078 = vmatprep.subr.bf16.mxu0 %v2211_v8  ;;  %1024 = vmatprep.subr.bf16.mxu1 %v2302_v29  ;;  %v2332_v8 = vld [vmem:[%s2856_s13 + $0x120] ss:$16 sps:$4 sm:$0xff]   ;;  %v2337_v9 = vld [vmem:[%s2856_s13 + $0x144] ss:$16 sps:$4 sm:$0xff]   ;;  %v437_v29 = vsub.s32 0, %v2875_v12 }
  0xd9   : > { %1025 = vmatpush1.bf16.msra.mxu1 %v2304_v32  ;;  %v441_v32 = vsub.s32 1, %v2875_v12 }
  0xda   : > { %1079 = vmatpush1.bf16.msra.mxu0 %v2209_v13  ;;  %1546 = vmatprep.subr.bf16.mxu1 %v2307_v33  ;;  %v2340_v13 = vld [vmem:[%s2856_s13 + $0x164] ss:$16 sps:$4 sm:$0xff]  }
  0xdb   : > { %1080 = vmatprep.subr.bf16.mxu0 %v2216_v14  ;;  %v2622_v14 = vmov 0  }
  0xdc   : > { %1027 = vmatmul.mubr.bf16.vlgmr.msra.gmra.mrb[0].mxu1 %v2940_v1  ;;  %v2331_v1 = vld [vmem:[%s2856_s13 + $0x104] ss:$16 sps:$4 sm:$0xff]  }
  0xdd   : > { %1547 = vmatpush1.bf16.msra.mxu1 %v2305_v36 }
  0xde   : > { %1081 = vmatpush1.bf16.msra.mxu0 %v2214_v17  ;;  %1548 = vmatprep.subr.bf16.mxu1 %v2310_v37  ;;  %v2341_v17 = vld [vmem:[%s2856_s13 + $0x180] ss:$16 sps:$4 sm:$0xff]  }
  0xdf   : > { %1082 = vmatprep.subr.bf16.mxu0 %v2222_v18  ;;  %v492_v18 = vcombine.high %v2903_v30, %v2903_v30 }
  0xe1   : > { %1549 = vmatpush1.bf16.msra.mxu1 %v2308_v40 }
  0xe2   : > { %1083 = vmatpush1.bf16.msra.mxu0 %v2220_v21  ;;  %1550 = vmatprep.subr.bf16.mxu1 %v2313_v41  ;;  %v2349_v21 = vld [vmem:[%s2856_s13 + $0x1c4] ss:$16 sps:$4 sm:$0xff]  }
  0xe3   : > { %1084 = vmatprep.subr.bf16.mxu0 %v2228_v22  ;;  %v2347_v22 = vld [vmem:[%s2856_s13 + $0x1c0] ss:$16 sps:$4 sm:$0xff]  }
  0xe5   : > { %1551 = vmatpush1.bf16.msra.mxu1 %v2311_v44 }
  0xe6   : > { %1085 = vmatpush1.bf16.msra.mxu0 %v2226_v25  ;;  %1552 = vmatprep.subr.bf16.mxu1 %v2316_v45  ;;  %v2355_v25 = vld [vmem:[%s2856_s13 + $0xc] ss:$16 sps:$4 sm:$0xff]  }
  0xe7   : > { %1086 = vmatprep.subr.bf16.mxu0 %v2234_v26 }
  0xe9   : > { %1553 = vmatpush1.bf16.msra.mxu1 %v2314_v48  ;;  %v2358_v48 = vld [vmem:[%s2856_s13 + $0x2c] ss:$16 sps:$4 sm:$0xff]  }
  0xea   : > { %1087 = vmatpush1.bf16.msra.mxu0 %v2232_v28  ;;  %1554 = vmatprep.subr.bf16.mxu1 %v2319_v49  ;;  %v2356_v49 = vld [vmem:[%s2856_s13 + $0x28] ss:$16 sps:$4 sm:$0xff]  }
  0xeb   : > { %1088 = vmatprep.subr.bf16.mxu0 %v2240_v31  ;;  %v433_v31 = vld [vmem:[%s432_s9] sm:$0x3] }
  0xec   : > { %v438_v33 = vrot.slane %v433_v31, %v437_v29 }
  0xed   : > { %1555 = vmatpush1.bf16.msra.mxu1 %v2317_v52  ;;  %v2364_v52 = vld [vmem:[%s2856_s13 + $0x6c] ss:$16 sps:$4 sm:$0xff]  }
  0xee   : > { %1089 = vmatpush1.bf16.msra.mxu0 %v2238_v34  ;;  %1556 = vmatprep.subr.bf16.mxu1 %v2322_v53  ;;  %v442_v34 = vrot.slane %v433_v31, %v441_v32  ;;  %v2362_v53 = vld [vmem:[%s2856_s13 + $0x68] ss:$16 sps:$4 sm:$0xff]  }
  0xef   : > { %1090 = vmatprep.subr.bf16.mxu0 %v2246_v35 }
  0xf1   : > { %1557 = vmatpush1.bf16.msra.mxu1 %v2320_v56  ;;  %v2370_v56 = vld [vmem:[%s2856_s13 + $0xac] ss:$16 sps:$4 sm:$0xff]  }
  0xf2   : > { %1091 = vmatpush1.bf16.msra.mxu0 %v2244_v38  ;;  %1558 = vmatprep.subr.bf16.mxu1 %v2325_v57  ;;  %v2368_v57 = vld [vmem:[%s2856_s13 + $0xa8] ss:$16 sps:$4 sm:$0xff]  }
  0xf3   : > { %1092 = vmatprep.subr.bf16.mxu0 %v2252_v39 }
  0xf5   : > { %1559 = vmatpush1.bf16.msra.mxu1 %v2323_v60  ;;  %v2376_v60 = vld [vmem:[%s2856_s13 + $0xec] ss:$16 sps:$4 sm:$0xff]  }
  0xf6   : > { %1093 = vmatpush1.bf16.msra.mxu0 %v2250_v42  ;;  %1560 = vmatprep.subr.bf16.mxu1 %v2328_v61  ;;  %v2374_v61 = vld [vmem:[%s2856_s13 + $0xe8] ss:$16 sps:$4 sm:$0xff]  }
  0xf7   : > { %1094 = vmatprep.subr.bf16.mxu0 %v2258_v43 }
  0xf9   : > { %1561 = vmatpush1.bf16.msra.mxu1 %v2326_v0  ;;  %v2382_v0 = vld [vmem:[%s2856_s13 + $0x12c] ss:$16 sps:$4 sm:$0xff]  }
  0xfa   : > { %1095 = vmatpush1.bf16.msra.mxu0 %v2256_v46  ;;  %1562 = vmatprep.subr.bf16.mxu1 %v2331_v1  ;;  %v2353_v46 = vld [vmem:[%s2856_s13 + $0x8] ss:$16 sps:$4 sm:$0xff]  }
  0xfb   : > { %1096 = vmatprep.subr.bf16.mxu0 %v2264_v47  ;;  %v2380_v1 = vld [vmem:[%s2856_s13 + $0x128] ss:$16 sps:$4 sm:$0xff]  }
  0xfd   : > { %1563 = vmatpush1.bf16.msra.mxu1 %v2329_v4  ;;  %v2388_v4 = vld [vmem:[%s2856_s13 + $0x16c] ss:$16 sps:$4 sm:$0xff]  }
  0xfe   : > { %1097 = vmatpush1.bf16.msra.mxu0 %v2262_v50  ;;  %1564 = vmatprep.subr.bf16.mxu1 %v2334_v5  ;;  %v2361_v50 = vld [vmem:[%s2856_s13 + $0x4c] ss:$16 sps:$4 sm:$0xff]   ;;  %v2386_v5 = vld [vmem:[%s2856_s13 + $0x168] ss:$16 sps:$4 sm:$0xff]  }
  0xff   : > { %1098 = vmatprep.subr.bf16.mxu0 %v2270_v51  ;;  %v2359_v51 = vld [vmem:[%s2856_s13 + $0x48] ss:$16 sps:$4 sm:$0xff]  }
 0x101   : > { %1565 = vmatpush1.bf16.msra.mxu1 %v2332_v8  ;;  %v2394_v8 = vld [vmem:[%s2856_s13 + $0x1ac] ss:$16 sps:$4 sm:$0xff]  }
 0x102   : > { %1099 = vmatpush1.bf16.msra.mxu0 %v2268_v54  ;;  %1566 = vmatprep.subr.bf16.mxu1 %v2337_v9  ;;  %v2367_v54 = vld [vmem:[%s2856_s13 + $0x8c] ss:$16 sps:$4 sm:$0xff]   ;;  %v2392_v9 = vld [vmem:[%s2856_s13 + $0x1a8] ss:$16 sps:$4 sm:$0xff]  }
 0x103   : > { %1100 = vmatprep.subr.bf16.mxu0 %v2276_v55  ;;  %v2365_v55 = vld [vmem:[%s2856_s13 + $0x88] ss:$16 sps:$4 sm:$0xff]  }
 0x105   : > { %1567 = vmatpush1.bf16.msra.mxu1 %v2335_v11  ;;  %v2395_v11 = vld [vmem:[%s2856_s13 + $0x1c8] ss:$16 sps:$4 sm:$0xff]  }
 0x106   : > { %1101 = vmatpush1.bf16.msra.mxu0 %v2274_v58  ;;  %1568 = vmatprep.subr.bf16.mxu1 %v2340_v13  ;;  %v2373_v58 = vld [vmem:[%s2856_s13 + $0xcc] ss:$16 sps:$4 sm:$0xff]  }
 0x107   : > { %1102 = vmatprep.subr.bf16.mxu0 %v2282_v59  ;;  %v2371_v59 = vld [vmem:[%s2856_s13 + $0xc8] ss:$16 sps:$4 sm:$0xff]   ;;  %v2400_v13 = vld [vmem:[%s2856_s13 + $0x1ec] ss:$16 sps:$4 sm:$0xff]  }
 0x109   : > { %1569 = vmatpush1.bf16.msra.mxu1 %v2338_v15 }
 0x10a   : > { %1103 = vmatpush1.bf16.msra.mxu0 %v2280_v62  ;;  %1570 = vmatprep.subr.bf16.mxu1 %v2343_v16  ;;  %v2379_v62 = vld [vmem:[%s2856_s13 + $0x10c] ss:$16 sps:$4 sm:$0xff]  }
 0x10b   : > { %1104 = vmatprep.subr.bf16.mxu0 %v2288_v63  ;;  %v2377_v63 = vld [vmem:[%s2856_s13 + $0x108] ss:$16 sps:$4 sm:$0xff]  }
 0x10d   : > { %1571 = vmatpush1.bf16.msra.mxu1 %v2341_v17 }
 0x10e   : > { %1105 = vmatpush1.bf16.msra.mxu0 %v2286_v2  ;;  %1572 = vmatprep.subr.bf16.mxu1 %v2346_v20  ;;  %v2385_v2 = vld [vmem:[%s2856_s13 + $0x14c] ss:$16 sps:$4 sm:$0xff]  }
 0x10f   : > { %1106 = vmatprep.subr.bf16.mxu0 %v2294_v3  ;;  %v2383_v3 = vld [vmem:[%s2856_s13 + $0x148] ss:$16 sps:$4 sm:$0xff]  }
 0x111   : > { %1573 = vmatpush1.bf16.msra.mxu1 %v2344_v19 }
 0x112   : > { %1107 = vmatpush1.bf16.msra.mxu0 %v2292_v6  ;;  %1574 = vmatprep.subr.bf16.mxu1 %v2349_v21  ;;  %v2391_v6 = vld [vmem:[%s2856_s13 + $0x18c] ss:$16 sps:$4 sm:$0xff]  }
 0x113   : > { %1117 = vmatprep.subr.bf16.mxu0 %v2300_v7  ;;  %v2389_v7 = vld [vmem:[%s2856_s13 + $0x188] ss:$16 sps:$4 sm:$0xff]  }
 0x115   : > { %1109 = vmatmul.mubr.bf16.vlgmr.msra.gmra.mrb[0].mxu0 %v2903_v30  ;;  %1575 = vmatpush1.bf16.msra.mxu1 %v2347_v22 }
 0x116   : > { %1118 = vmatpush1.bf16.msra.mxu0 %v2298_v10  ;;  %1149 = vmatprep.mubr.bf16.mxu0 %v2622_v14  ;;  %v2397_v10 = vld [vmem:[%s2856_s13 + $0x1cc] ss:$16 sps:$4 sm:$0xff]   ;;  %v2398_v14 = vld [vmem:[%s2856_s13 + $0x1e8] ss:$16 sps:$4 sm:$0xff]  }
 0x117   : > { %1576 = vmatprep.subr.bf16.mxu1 %v2352_v23  ;;  %v2623_v23 = vmov (!%p2034_p1), 1983009808  }
 0x119   : > { %1577 = vmatpush1.bf16.msra.mxu1 %v2350_v24  ;;  %v1639_v24 = vunpack.c.l.s4 (!%p2034_p1), %v2623_v23 }
 0x11a   : > { %1587 = vmatprep.subr.bf16.mxu1 %v2355_v25 }
 0x121   : > { %1969 = vmatmul.mubr.msk.bf16.vlgmr.msra.gmra.mrb[0].mxu0 %vm990_vm0, %v492_v18 }
 0x1af   : > { %v1028_v30 = vpop.f32.mrb[0].mxu1 }
 0x1b0   : > { %v1030_v26 = vpop.f32.mrb[1].mxu1  ;;  %v1029_v35 = vadd.f32 %v1028_v30, %v438_v33 }
 0x1b1   : > { %v1032_v27 = vpop.f32.mrb[2].mxu1  ;;  %v1031_v36 = vadd.f32 %v1030_v26, %v442_v34  ;;  %v1640_v26 = vunpack.c.0.s8 (!%p2034_p1), %v1639_v24 }
 0x1b2   : > { %v1033_v28 = vpop.f32.mrb[3].mxu1 }
 0x1b3   : > { %v1643_v27 = vsub.s32 (!%p2034_p1), %v1640_v26, %v2875_v12 }
 0x1f4   : > { %v1151_v37 = vpop.f32.mrb[0].mxu0 }
 0x1f5   : > { %v2044_v38 = vadd.f32 %v1151_v37, %v1029_v35  ;;  %v1153_v39 = vpop.f32.mrb[1].mxu0 }
 0x1f6   : > { %v2046_v40 = vadd.f32 %v1153_v39, %v1031_v36  ;;  %v1155_v41 = vpop.f32.mrb[2].mxu0 }
 0x1f7   : > { %v1158_v42 = vmax.f32 %v2044_v38, 0.0  ;;  %v1156_v43 = vpop.f32.mrb[3].mxu0 }
 0x1f8   : > { %v1159_v44 = vmax.f32 %v2046_v40, 0.0 }
 0x1f9   : > { %v3039_v47 = vpack.c.bf16 %v1158_v42, %v1158_v42 }
 0x1fa   : > { %v1161_v45 = vpack.c.bf16 %v1159_v44, %v1159_v44 }
 0x1fc   : > { %1578 = vmatprep.mubr.bf16.mxu1 %v1161_v45 }
 0x1fd   : > { %1579 = vmatmul.mubr.bf16.vlgmr.msra.gmra.mrb[4].mxu1 %v3039_v47 }
 0x1fe   : > { %1588 = vmatpush1.bf16.msra.mxu1 %v2353_v46  ;;  %1619 = vmatprep.mubr.bf16.mxu1 %v1161_v45 }
 0x1ff   : > { %1589 = vmatprep.subr.bf16.mxu1 %v2358_v48 }
 0x202   : > { %1590 = vmatpush1.bf16.msra.mxu1 %v2356_v49 }
 0x203   : > { %1591 = vmatprep.subr.bf16.mxu1 %v2361_v50 }
 0x206   : > { %1592 = vmatpush1.bf16.msra.mxu1 %v2359_v51 }
 0x207   : > { %1593 = vmatprep.subr.bf16.mxu1 %v2364_v52 }
 0x20a   : > { %1594 = vmatpush1.bf16.msra.mxu1 %v2362_v53 }
 0x20b   : > { %1595 = vmatprep.subr.bf16.mxu1 %v2367_v54 }
 0x20e   : > { %1596 = vmatpush1.bf16.msra.mxu1 %v2365_v55 }
 0x20f   : > { %1597 = vmatprep.subr.bf16.mxu1 %v2370_v56 }
 0x212   : > { %1598 = vmatpush1.bf16.msra.mxu1 %v2368_v57 }
 0x213   : > { %1599 = vmatprep.subr.bf16.mxu1 %v2373_v58 }
 0x216   : > { %1600 = vmatpush1.bf16.msra.mxu1 %v2371_v59 }
 0x217   : > { %1601 = vmatprep.subr.bf16.mxu1 %v2376_v60 }
 0x21a   : > { %1602 = vmatpush1.bf16.msra.mxu1 %v2374_v61 }
 0x21b   : > { %1603 = vmatprep.subr.bf16.mxu1 %v2379_v62 }
 0x21e   : > { %1604 = vmatpush1.bf16.msra.mxu1 %v2377_v63 }
 0x21f   : > { %1605 = vmatprep.subr.bf16.mxu1 %v2382_v0 }
 0x222   : > { %1606 = vmatpush1.bf16.msra.mxu1 %v2380_v1 }
 0x223   : > { %1607 = vmatprep.subr.bf16.mxu1 %v2385_v2 }
 0x226   : > { %1608 = vmatpush1.bf16.msra.mxu1 %v2383_v3 }
 0x227   : > { %1609 = vmatprep.subr.bf16.mxu1 %v2388_v4 }
 0x22a   : > { %1610 = vmatpush1.bf16.msra.mxu1 %v2386_v5 }
 0x22b   : > { %1611 = vmatprep.subr.bf16.mxu1 %v2391_v6 }
 0x22e   : > { %1612 = vmatpush1.bf16.msra.mxu1 %v2389_v7 }
 0x22f   : > { %1613 = vmatprep.subr.bf16.mxu1 %v2394_v8 }
 0x232   : > { %1614 = vmatpush1.bf16.msra.mxu1 %v2392_v9 }
 0x233   : > { %1615 = vmatprep.subr.bf16.mxu1 %v2397_v10 }
 0x236   : > { %1616 = vmatpush1.bf16.msra.mxu1 %v2395_v11 }
 0x237   : > { %1617 = vmatprep.subr.bf16.mxu1 %v2400_v13 }
 0x23a   : > { %1618 = vmatpush1.bf16.msra.mxu1 %v2398_v14 }
 0x23d   : > { %1620 = vmatmul.mubr.bf16.vlgmr.msra.gmra.mrb[8].mxu1 %v3039_v47 }
 0x2d0   : > { %v1580_v15 = vpop.f32.mrb[4].mxu1 }
 0x2d1   : > { %v1582_v16 = vpop.f32.mrb[5].mxu1 }
 0x2d2   : > { %v1584_v17 = vpop.f32.mrb[6].mxu1  ;;  %v1636_v25 = vcombine.low (!%p2034_p1), %v1580_v15, %v1582_v16 }
 0x2d3   : > { %v1585_v18 = vpop.f32.mrb[7].mxu1 }
 0x2d4   : > { %v1644_v28 = vrot.slane (!%p2034_p1), %v1636_v25, %v1643_v27 }
 0x30d   : > { %1631 = sbr.rel (%p2034_p1) target bundleno = 793 (0x319), region = 60 }
 0x310   : > { %v1621_v19 = vpop.f32.mrb[8].mxu1 }
 0x311   : > { %v1623_v20 = vpop.f32.mrb[9].mxu1 }
 0x312   : > { %v1625_v21 = vpop.f32.mrb[10].mxu1  ;;  %v1637_v30 = vcombine.low (!%p2034_p1), %v1621_v19, %v1623_v20 }
 0x313   : > { %v1626_v22 = vpop.f32.mrb[11].mxu1 }
 0x314   : > { %v1651_v31 = vrot.slane %v1637_v30, %v1643_v27 }
 0x316   : > { %v1652_v33 = vcombine.low %v1644_v28, %v1651_v31 }
 0x318   : > { %1654 = vst [vmem:[#allocation9] sm:$0xff] %v1652_v33 }
 0x319 PF: > { %p2035_p4 = scmp.eq.s32.totalorder %s2601_s21, 0 }
 0x31a   : > { %v2624_v34 = vmov (!%p2035_p4), 1983009808   ;;  %v1664_v36 = vcombine.low (!%p2035_p4), %v1580_v15, %v1582_v16  ;;  %v1665_v37 = vcombine.low (!%p2035_p4), %v1621_v19, %v1623_v20 }
 0x31b   : > { %1658 = sbr.rel (%p2035_p4) target bundleno = 808 (0x328), region = 64  ;;  %v1667_v35 = vunpack.c.l.s4 (!%p2035_p4), %v2624_v34 }
 0x31d   : > { %v1668_v38 = vunpack.c.0.s8 (!%p2035_p4), %v1667_v35 }
 0x31f   : > { %v1671_v39 = vsub.s32 (!%p2035_p4), %v1668_v38, %v2875_v12  ;;  %v1659_v42 = vld [vmem:[#allocation9] sm:$0xff] (!%p2035_p4) }
 0x321   : > { %v1672_v40 = vrot.slane (!%p2035_p4), %v1664_v36, %v1671_v39  ;;  %v1679_v41 = vrot.slane (!%p2035_p4), %v1665_v37, %v1671_v39 }
 0x323   : > { %v1680_v43 = vcombine.low %v1672_v40, %v1679_v41 }
 0x325   : > { %v1682_v44 = vadd.f32 %v1680_v43, %v1659_v42 }
 0x327   : > { %1683 = vst [vmem:[#allocation9] sm:$0xff] %v1682_v44 }
 0x328 PF: > { %p2036_p3 = scmp.ne.s32.totalorder %s2601_s21, 2 }
 0x329   : > { %v1689_v45 = vld [vmem:[#allocation8] sm:$0xf] (!%p2036_p3)  ;;  %v1701_v46 = vsub.s32 (!%p2036_p3), 2, %v2875_v12  ;;  %v1705_v47 = vsub.s32 (!%p2036_p3), 3, %v2875_v12  ;;  %v2625_v52 = vmov (!%p2036_p3), 1983009808  }
 0x32a   : > { %1687 = sbr.rel (%p2036_p3) target bundleno = 825 (0x339), region = 68  ;;  %v1694_v48 = vrot.slane (!%p2036_p3), %v1689_v45, %v437_v29  ;;  %v1698_v49 = vrot.slane (!%p2036_p3), %v1689_v45, %v441_v32  ;;  %v1710_v53 = vunpack.c.l.s4 (!%p2036_p3), %v2625_v52 }
 0x32b   : > { %v1702_v50 = vrot.slane (!%p2036_p3), %v1689_v45, %v1701_v46  ;;  %v1706_v51 = vrot.slane (!%p2036_p3), %v1689_v45, %v1705_v47 }
 0x32c   : > { %v1707_v54 = vcombine.low (!%p2036_p3), %v1694_v48, %v1698_v49  ;;  %v1711_v56 = vunpack.c.0.s8 (!%p2036_p3), %v1710_v53 }
 0x32d   : > { %v1708_v55 = vcombine.low (!%p2036_p3), %v1702_v50, %v1706_v51 }
 0x32e   : > { %v1714_v57 = vsub.s32 (!%p2036_p3), %v1711_v56, %v2875_v12  ;;  %v1688_v60 = vld [vmem:[#allocation9] sm:$0xff] (!%p2036_p3) }
 0x330   : > { %v1715_v58 = vrot.slane (!%p2036_p3), %v1707_v54, %v1714_v57  ;;  %v1722_v59 = vrot.slane (!%p2036_p3), %v1708_v55, %v1714_v57 }
 0x332   : > { %v1723_v61 = vcombine.low %v1715_v58, %v1722_v59 }
 0x334   : > { %v1725_v62 = vadd.f32 %v1723_v61, %v1688_v60 }
 0x336   : > { %v1726_v63 = vmax.f32 %v1725_v62, 0.0 }
 0x338   : > { %1727 = vst [vmem:[#allocation9] sm:$0xff] %v1726_v63 }
 0x339 PF: > { %p2093_p0 = scmp.eq.s32.totalorder %s2686_s24, 2  ;;  %s2626_s21 = smov [#allocation9]  }
 0x33a   : > { %s1738_s11 = sshll.u32 %s2626_s21, 4  ;;  %s1739_s11 = int_to_ptr.vmem [resolvable:$true] %s1738_s11 }
 0x33b   : > { %s2517_s12 = scalar_lea.vmem %s1739_s11, 128  ;;  %p2524_p11 = scmp.lt.s32.totalorder %s1739_s11, %s1739_s11 }
 0x33c   : > { %p2518_p9 = scmp.ne.s32.totalorder %s1739_s11, %s2517_s12  ;;  %p2525_p8 = scmp.lt.s32.totalorder %s2517_s12, %s2517_s12 }
 0x33e   : > { %p2519_p5 = pnand %p2518_p9, %p2093_p0  ;;  %p2526_p7 = por %p2525_p8, %p2524_p11 }
 0x340   : > { %p2520_p10 = pneg %p2519_p5 }
 0x342   : > { %p2527_p13 = pnand %p2526_p7, %p2520_p10 }
 0x344   : > { %2530 = shalt.err (!%p2527_p13)
}
 0x345   : > { %s2531_s16 = scalar_lea.hbm %s3131_s5, 128 }
 0x346   : > { %p2532_p12 = scmp.ne.s32.totalorder %s3131_s5, %s2531_s16  ;;  %p2537_p1 = scmp.lt.u32.totalorder %s2531_s16, %s3131_s5 }
 0x348   : > { %p2533_p2 = pnand %p2532_p12, %p2093_p0 }
 0x34a   : > { %p2534_p6 = pneg %p2533_p2 }
 0x34c   : > { %p2539_p4 = pnand %p2537_p1, %p2534_p6 }
 0x34e   : > { %2542 = shalt.err (!%p2539_p4)
}
 0x34f   : > { %2071 = dma.vmem_to_hbm [thread:$0]  (%p2093_p0), %s1739_s11, 128, %s3131_s5, [#allocation4]  }
 0x350   : > { %2584 = dma.done.wait (%p2093_p0), [#allocation4], 128  }
 0x351   : > { %2586 = vsyncadd (%p2093_p0), [#allocation4], 4294967168 }
 0x352 PF: > { %s20_s23 = sadd.s32 1, %s2609_s23   ;;  %s3161_s30 = sld [smem:[#allocation16_spill]] }
 0x353   : > { %p17_p3 = scmp.ge.s32.totalorder %s20_s23, 5   ;;  %s3162_s2 = sld [smem:[#allocation15_spill]] }
 0x354   : > { %s3163_s18 = smov %s2593_s19  ;;  %s3164_s19 = smov %s2597_s20 }
 0x355   : > { %s3166_s21 = smov %s2605_s22  ;;  %19 = sbr.rel (!%p17_p3) target bundleno = 9 (0x9), region = 113 }
 0x358   : > { %s3165_s20 = smov %s3161_s30 }
 0x359   : > { %s3167_s22 = smov %s3162_s2 }
 0x35c   :  { %1751 = vsyncpa [#allocation3], 1 }
 0x35d   :  { %1753 = vsyncpa [#allocation3 + $0x1], 1 }
 0x35e   :  { %1754 = vsyncpa [#allocation6], 1 }
 0x35f   :  { %1755 = vsyncpa [#allocation4], 1 }
 0x360   :  { %1757 = vsyncpa [#allocation4 + $0x1], 1 }

</bundles_post_ra>
